<compile_context>
chip_gen: v5e
topology: v5e:2x2
jax: 0.10.0
libtpu: 0.0.40
codegen_flags: <defaults>
</compile_context>

<pallas_src>
import jax
import jax.numpy as jnp
from jax.experimental import pallas as pl
from jax.experimental.pallas import tpu as pltpu

# -------------------- small synthetic configuration --------------------
B = 2                    # real batch size
IN_SIZE = 32             # MLP in_size
H1, H2 = 24, 16          # MLP hidden_sizes
OUT_SIZE = 16            # MLP out_size
BN_EPS = 1e-5            # nn.BatchNorm1d default eps

# -------------------- compact packed-slab layout --------------------
# Contraction widths (feature + 1 "ones" lane, padded to a multiple of 16 for bf16 tiles)
K1 = 48                  # IN_SIZE(32) + ones lane, padded
K2 = 32                  # H1(24)      + ones lane, padded
K3 = 32                  # H2(16)      + ones lane, padded
NOUT = 128               # lane-dense output width; cols [0, OUT_SIZE) are meaningful

ROW_W1 = 0               # rows [  0, 48): [W1^T | b1-row (with 1.0 at col H1)]
ROW_W2 = ROW_W1 + K1     # rows [ 48, 80): [W2^T | b2-row (with 1.0 at col H2)]
ROW_W3 = ROW_W2 + K2     # rows [ 80,112): [fc3 (+ folded BN) | folded-bias row]
SLAB_ROWS = ROW_W3 + K3  # 112 rows x 128 lanes (bf16) ~= 28 KiB

BM = 8                   # batch rows per grid step (one sublane group) for small batches


def _mlp_kernel(x_ref, slab_ref, o_ref):
    """Pure 3-dot chain with two relus; biases and eval-mode BN are pre-folded into
    the slab (ones-lane trick), so there are no adds and no epilogue."""
    f32, bf16 = jnp.float32, jnp.bfloat16

    x = x_ref[...].astype(bf16)                         # (BM, K1); lane IN_SIZE == 1.0
    w1 = slab_ref[ROW_W1:ROW_W1 + K1, :]                # (K1, 128) bf16, tile-aligned view
    w2 = slab_ref[ROW_W2:ROW_W2 + K2, :]                # (K2, 128)
    w3 = slab_ref[ROW_W3:ROW_W3 + K3, :]                # (K3, 128)

    # Zero padding keeps all padded lanes exactly zero through every stage, and the
    # bias rows re-emit a 1.0 lane (relu(1)=1), so no masking is needed anywhere.
    h = jnp.dot(x, w1, preferred_element_type=f32)                  # (BM, 128)
    h = jnp.maximum(h, 0.0)[:, :K2].astype(bf16)                    # feats + ones lane
    h = jnp.dot(h, w2, preferred_element_type=f32)
    h = jnp.maximum(h, 0.0)[:, :K3].astype(bf16)
    o_ref[...] = jnp.dot(h, w3, preferred_element_type=f32)         # lane-dense store


@jax.jit
def mlp_forward(x, slab):
    """Pallas forward of MLP.forward (eval mode). x: (B, IN_SIZE) -> (B, OUT_SIZE)."""
    b = x.shape[0]
    bm = BM if b <= BM else 256          # raise the M tile for big batches (v6e/v7x MXU)
    bp = -(-b // bm) * bm

    # Single wrapper-side layout op: real features in lanes [0, IN_SIZE), constant 1.0
    # in the "ones" lane (drives the bias rows of the slab), zeros elsewhere.
    x_aug = jnp.zeros((bp, K1), jnp.float32)
    x_aug = x_aug.at[:b, :IN_SIZE].set(x)
    x_aug = x_aug.at[:, IN_SIZE].set(1.0)

    out = pl.pallas_call(
        _mlp_kernel,
        out_shape=jax.ShapeDtypeStruct((bp, NOUT), jnp.float32),
        grid=(bp // bm,),
        in_specs=[
            pl.BlockSpec((bm, K1), lambda i: (i, 0)),             # activations: batch-tiled
            pl.BlockSpec((SLAB_ROWS, NOUT), lambda i: (0, 0)),    # slab: VMEM-resident
        ],
        out_specs=pl.BlockSpec((bm, NOUT), lambda i: (i, 0)),
        compiler_params=pltpu.CompilerParams(
            dimension_semantics=("parallel",)),                   # shards over v7x's 2 TCs
    )(x_aug, slab)

    return out[:b, :OUT_SIZE]


# -------------------- parameter init / packing / reference --------------------
def init_params(key):
    """Matches MLP.__init_layers: xavier_normal_ weights, zero biases (torch [out,in])."""
    ks = jax.random.split(key, 3)

    def xavier(k, fan_out, fan_in):
        std = jnp.sqrt(2.0 / (fan_in + fan_out))
        return std * jax.random.normal(k, (fan_out, fan_in), jnp.float32)

    return dict(
        w1=xavier(ks[0], H1, IN_SIZE), b1=jnp.zeros((H1,), jnp.float32),
        w2=xavier(ks[1], H2, H1),      b2=jnp.zeros((H2,), jnp.float32),
        w3=xavier(ks[2], OUT_SIZE, H2), b3=jnp.zeros((OUT_SIZE,), jnp.float32),
        # BatchNorm1d parameters / running stats (only used when have_last_bn=True)
        bn_gamma=jnp.ones((OUT_SIZE,), jnp.float32),
        bn_beta=jnp.zeros((OUT_SIZE,), jnp.float32),
        bn_mean=jnp.zeros((OUT_SIZE,), jnp.float32),
        bn_var=jnp.ones((OUT_SIZE,), jnp.float32),
    )


def pack_slab(p, have_last_bn=False):
    """Pack fc1/fc2/fc3 (+ fully folded eval-mode BN) into one compact (112,128) bf16 slab.
    Each weight block carries one extra contraction row holding its bias, and that row's
    next free column holds a 1.0 that regenerates the ones lane for the following layer."""
    if have_last_bn:
        s = p["bn_gamma"] * jax.lax.rsqrt(p["bn_var"] + BN_EPS)
        t = p["bn_beta"] - p["bn_mean"] * s
    else:
        s = jnp.ones((OUT_SIZE,), jnp.float32)
        t = jnp.zeros((OUT_SIZE,), jnp.float32)
    w3f = p["w3"] * s[:, None]          # fold BN scale into fc3 weight (torch [out,in])
    b3f = p["b3"] * s + t               # fold BN shift into fc3 bias

    slab = jnp.zeros((SLAB_ROWS, NOUT), jnp.float32)
    # layer 1
    slab = slab.at[ROW_W1:ROW_W1 + IN_SIZE, :H1].set(p["w1"].T)
    slab = slab.at[ROW_W1 + IN_SIZE, :H1].set(p["b1"])
    slab = slab.at[ROW_W1 + IN_SIZE, H1].set(1.0)        # re-emit ones lane at col H1
    # layer 2
    slab = slab.at[ROW_W2:ROW_W2 + H1, :H2].set(p["w2"].T)
    slab = slab.at[ROW_W2 + H1, :H2].set(p["b2"])
    slab = slab.at[ROW_W2 + H1, H2].set(1.0)             # re-emit ones lane at col H2
    # layer 3 (BN folded in)
    slab = slab.at[ROW_W3:ROW_W3 + H2, :OUT_SIZE].set(w3f.T)
    slab = slab.at[ROW_W3 + H2, :OUT_SIZE].set(b3f)
    return slab.astype(jnp.bfloat16)


def reference(x, p, have_last_bn=False):
    """Pure-JAX mirror of MLP.forward (eval mode), in f32."""
    h = jnp.maximum(x @ p["w1"].T + p["b1"], 0.0)
    h = jnp.maximum(h @ p["w2"].T + p["b2"], 0.0)
    h = h @ p["w3"].T + p["b3"]
    if have_last_bn:
        inv = p["bn_gamma"] * jax.lax.rsqrt(p["bn_var"] + BN_EPS)
        h = (h - p["bn_mean"]) * inv + p["bn_beta"]
    return h


if __name__ == "__main__":
    key = jax.random.PRNGKey(0)
    kx, kp, kb = jax.random.split(key, 3)

    params = init_params(kp)
    x = jax.random.normal(kx, (B, IN_SIZE), jnp.float32)

    # have_last_bn = False (module default)
    out = jax.block_until_ready(mlp_forward(x, pack_slab(params, have_last_bn=False)))
    ref = reference(x, params, have_last_bn=False)
    assert out.shape == (B, OUT_SIZE)
    assert jnp.allclose(out, ref, atol=3e-2, rtol=3e-2), float(jnp.max(jnp.abs(out - ref)))

    # have_last_bn = True: eval-mode BN folded into the fc3 slab rows; same compiled kernel.
    kb1, kb2, kb3, kb4 = jax.random.split(kb, 4)
    params_bn = dict(params)
    params_bn.update(
        bn_gamma=1.0 + 0.1 * jax.random.normal(kb1, (OUT_SIZE,), jnp.float32),
        bn_beta=0.1 * jax.random.normal(kb2, (OUT_SIZE,), jnp.float32),
        bn_mean=0.1 * jax.random.normal(kb3, (OUT_SIZE,), jnp.float32),
        bn_var=1.0 + 0.5 * jax.random.uniform(kb4, (OUT_SIZE,), jnp.float32),
    )
    out_bn = jax.block_until_ready(mlp_forward(x, pack_slab(params_bn, have_last_bn=True)))
    ref_bn = reference(x, params_bn, have_last_bn=True)
    assert jnp.allclose(out_bn, ref_bn, atol=3e-2, rtol=3e-2), \
        float(jnp.max(jnp.abs(out_bn - ref_bn)))

    print("KERNEL_OK")
</pallas_src>

<mosaic_0001>
module attributes {stable_mosaic.version = 11 : i64} {
  func.func @_mlp_kernel(%arg0: i32, %arg1: memref<8x48xf32, #tpu.memory_space<vmem>>, %arg2: memref<112x128xbf16, #tpu.memory_space<vmem>>, %arg3: memref<8x128xf32, #tpu.memory_space<vmem>>) attributes {dimension_semantics = [#tpu.dimension_semantics<parallel>], iteration_bounds = array<i64: 1>, scalar_prefetch = 0 : i64, scratch_operands = 0 : i64, tpu.core_type = #tpu.core_type<tc>, window_params = [{transform_indices = @transform_0, window_bounds = array<i64: 8, 48>}, {pipeline_mode = #tpu.pipeline_mode<synchronous>, transform_indices = @transform_1, window_bounds = array<i64: 112, 128>}, {transform_indices = @transform_2, window_bounds = array<i64: 8, 128>}]} {
    %c0 = arith.constant 0 : index
    %c0_0 = arith.constant 0 : index
    %0 = vector.load %arg1[%c0, %c0_0] : memref<8x48xf32, #tpu.memory_space<vmem>>, vector<8x48xf32>
    %1 = arith.truncf %0 : vector<8x48xf32> to vector<8x48xbf16>
    %c0_1 = arith.constant 0 : index
    %c0_2 = arith.constant 0 : index
    %2 = vector.load %arg2[%c0_1, %c0_2] : memref<112x128xbf16, #tpu.memory_space<vmem>>, vector<48x128xbf16>
    %c48 = arith.constant 48 : index
    %c0_3 = arith.constant 0 : index
    %3 = vector.load %arg2[%c48, %c0_3] : memref<112x128xbf16, #tpu.memory_space<vmem>>, vector<32x128xbf16>
    %c80 = arith.constant 80 : index
    %c0_4 = arith.constant 0 : index
    %4 = vector.load %arg2[%c80, %c0_4] : memref<112x128xbf16, #tpu.memory_space<vmem>>, vector<32x128xbf16>
    %cst = arith.constant dense<0.000000e+00> : vector<8x128xf32>
    %5 = tpu.matmul %1, %2, %cst {dimension_numbers = #tpu.dot_dimension_numbers<[1], [0], [0], [1], [0, 0, 1, 1], [], []>} : vector<8x48xbf16>, vector<48x128xbf16>, vector<8x128xf32> -> vector<8x128xf32>
    %cst_5 = arith.constant 0.000000e+00 : f32
    %6 = vector.broadcast %cst_5 : f32 to vector<8x128xf32>
    %7 = arith.maximumf %5, %6 : vector<8x128xf32>
    %8 = vector.extract_strided_slice %7 {offsets = [0, 0], sizes = [8, 32], strides = [1, 1]} : vector<8x128xf32> to vector<8x32xf32>
    %9 = arith.truncf %8 : vector<8x32xf32> to vector<8x32xbf16>
    %cst_6 = arith.constant dense<0.000000e+00> : vector<8x128xf32>
    %10 = tpu.matmul %9, %3, %cst_6 {dimension_numbers = #tpu.dot_dimension_numbers<[1], [0], [0], [1], [0, 0, 1, 1], [], []>} : vector<8x32xbf16>, vector<32x128xbf16>, vector<8x128xf32> -> vector<8x128xf32>
    %cst_7 = arith.constant 0.000000e+00 : f32
    %11 = vector.broadcast %cst_7 : f32 to vector<8x128xf32>
    %12 = arith.maximumf %10, %11 : vector<8x128xf32>
    %13 = vector.extract_strided_slice %12 {offsets = [0, 0], sizes = [8, 32], strides = [1, 1]} : vector<8x128xf32> to vector<8x32xf32>
    %14 = arith.truncf %13 : vector<8x32xf32> to vector<8x32xbf16>
    %cst_8 = arith.constant dense<0.000000e+00> : vector<8x128xf32>
    %15 = tpu.matmul %14, %4, %cst_8 {dimension_numbers = #tpu.dot_dimension_numbers<[1], [0], [0], [1], [0, 0, 1, 1], [], []>} : vector<8x32xbf16>, vector<32x128xbf16>, vector<8x128xf32> -> vector<8x128xf32>
    %c0_9 = arith.constant 0 : index
    %c0_10 = arith.constant 0 : index
    %16 = vector.load %arg3[%c0_9, %c0_10] : memref<8x128xf32, #tpu.memory_space<vmem>>, vector<8x128xf32>
    tpu.vector_store %arg3[%c0_9, %c0_10], %15 {strides = array<i32>} : memref<8x128xf32, #tpu.memory_space<vmem>>, vector<8x128xf32>,
    return
  }
  func.func @transform_0(%arg0: i32) -> (i32, i32) {
    %c0_i32 = arith.constant 0 : i32
    %c0_i32_0 = arith.constant 0 : i32
    return %arg0, %c0_i32 : i32, i32
  }
  func.func @transform_1(%arg0: i32) -> (i32, i32) {
    %c0_i32 = arith.constant 0 : i32
    %c0_i32_0 = arith.constant 0 : i32
    %c0_i32_1 = arith.constant 0 : i32
    return %c0_i32, %c0_i32_0 : i32, i32
  }
  func.func @transform_2(%arg0: i32) -> (i32, i32) {
    %c0_i32 = arith.constant 0 : i32
    %c0_i32_0 = arith.constant 0 : i32
    return %arg0, %c0_i32 : i32, i32
  }
}

</mosaic_0001>

<bundles_post_ra>
// kernel: mlp_forward.1
= control target key start
LH: loop header
LB: loop body
LE: loop exit
PB: predicated region body
PF: predicated region fallthrough
CT: control target
= control target key end

     0   :  { %7 = vsyncpa [#allocation3], 0  ;;  %s213_s12 = smov [#allocation2]   ;;  %s214_s14 = smov 64   ;;  %s240_s0 = inlined_call_operand.vmem [shape: f32[8,48], index: 0, kind: input, shape index: {}]   ;;  %s241_s1 = inlined_call_operand.hbm [shape: bf16[112,128], index: 1, kind: input, shape index: {}]   ;;  %s242_s2 = inlined_call_operand.vmem [shape: f32[8,128], index: 2, kind: output, shape index: {}]  }
   0x1   :  { %s14_s11 = sshll.u32 %s241_s1, 4  ;;  %s16_s13 = sshll.u32 %s213_s12, 4  ;;  %s15_s11 = int_to_ptr.hbm [resolvable:$true] %s14_s11  ;;  %s17_s13 = int_to_ptr.vmem [resolvable:$true] %s16_s13 }
   0x2   :  { %s215_s15 = smov 4  }
   0x3   :  { %22 = dma.hbm_to_vmem [thread:$0]  %s15_s11, 896, %s17_s13, [#allocation3], %s214_s14, %s214_s14, %s215_s15  }
   0x4   :  { %211 = dma.done.wait [#allocation3], 896  }
   0x5   :  { %212 = vsyncadd [#allocation3], 4294966400  ;;  %v179_v0 = vld [vmem:[#allocation2 + $0x10] sm:$0xff]  ;;  %v181_v1 = vld [vmem:[#allocation2 + $0x20] sm:$0xff]  ;;  %vm62_vm0 = vcmask 392192   ;;  %vm93_vm1 = vcmask 261120  }
   0x6   :  { %71 = vmatpush.bf16.msra.mxu0 %v179_v0  ;;  %v178_v2 = vld [vmem:[#allocation2 + $0x8] sm:$0xff]  ;;  %103 = vmatpush.bf16.msra.mxu1 %v181_v1  ;;  %v177_v3 = vld [vmem:[#allocation2] sm:$0xff]  ;;  %v180_v6 = vld [vmem:[#allocation2 + $0x18] sm:$0xff] }
   0x7   :  { %v28_v4 = vld [vmem:[%s240_s0] sm:$0xff]  ;;  %v183_v7 = vld [vmem:[#allocation2 + $0x30] sm:$0xff]  ;;  %v182_v12 = vld [vmem:[#allocation2 + $0x28] sm:$0xff] }
   0x8   :  { %v29_v5 = vpack.c.bf16 %v28_v4, %v28_v4  ;;  %133 = vmatpush.bf16.msra.mxu2 %v183_v7 }
   0xa   :  { %72 = vmatpush.bf16.msra.mxu0 %v178_v2  ;;  %104 = vmatpush.bf16.msra.mxu1 %v180_v6 }
   0xc   :  { %134 = vmatpush.bf16.msra.mxu2 %v182_v12 }
   0xe   :  { %73 = vmatpush.bf16.msra.mxu0 %v177_v3 }
  0x11   :  { %158 = vmatmul.msk.bf16.vlgmr.msra.gmra.mxu0 %vm62_vm0, %v29_v5 }
  0x8e   :  { %v75_v8 = vpop.f32.mrf.mxu0 }
  0x8f   :  { %v79_v9 = vmax.f32 %v75_v8, 0.0 }
  0x91   :  { %v80_v10 = vpack.c.bf16 %v79_v9, %v79_v9 }
  0x93   :  { %167 = vmatmul.msk.bf16.vlgmr.msra.gmra.mxu1 %vm93_vm1, %v80_v10 }
  0x96   :  { %v77_v11 = vpop.f32.mrf.mxu0 }
 0x110   :  { %v106_v13 = vpop.f32.mrf.mxu1 }
 0x111   :  { %v110_v14 = vmax.f32 %v106_v13, 0.0 }
 0x113   :  { %v111_v15 = vpack.c.bf16 %v110_v14, %v110_v14 }
 0x115   :  { %176 = vmatmul.msk.bf16.vlgmr.msra.gmra.mxu2 %vm93_vm1, %v111_v15 }
 0x118   :  { %v108_v16 = vpop.f32.mrf.mxu1 }
 0x198   :  { %v136_v17 = vpop.f32.mrf.mxu2 }
 0x199   :  { %140 = vst [vmem:[%s242_s2] sm:$0xff] %v136_v17 }
 0x1a0   :  { %v138_v18 = vpop.f32.mrf.mxu2 }
 0x1a1   :  { %145 = vsyncpa [#allocation3], 1 }

</bundles_post_ra>
